<compile_context>
chip_gen: v7x
topology: tpu7x:2x2x1
jax: 0.10.0
libtpu: 0.0.40
codegen_flags: <defaults>
</compile_context>

<pallas_src>
import jax
import jax.numpy as jnp
from jax.experimental import pallas as pl
from jax.experimental.pallas import tpu as pltpu

LANE_WIDTH = 1024      # last dim of the streamed slab (multiple of 128)
ROW_TILE_MAX = 512     # (512, 1024) f32 = 2 MiB/block -> ~6 MiB VMEM with double buffering +
                       # accumulator; safe on v5e/v6e/v7x (could be raised on v5e/v6e).


def _make_max_kernel(rows_total, row_tile, inner_steps, needs_mask):
    def kernel(x_ref, o_ref, acc_ref):
        c = pl.program_id(0)          # chunk (parallel across TensorCores on v7x)
        i = pl.program_id(1)          # row-block step within the chunk (reduction axis)

        @pl.when(i == 0)
        def _():
            acc_ref[...] = jnp.full_like(acc_ref, -jnp.inf)

        x = x_ref[...].astype(jnp.float32)
        if needs_mask:
            # Mask rows past the end of the slab (partial last block and/or the fully
            # out-of-range padded step of an odd split) with -inf.
            row_start = (c * inner_steps + i) * row_tile
            row_ids = jax.lax.broadcasted_iota(jnp.int32, x.shape, 0) + row_start
            x = jnp.where(row_ids < rows_total, x, -jnp.inf)

        # Elementwise running max: stays in the VALU slots, overlaps with the DMA stream.
        acc_ref[...] = jnp.maximum(acc_ref[...], x)

        @pl.when(i == pl.num_programs(1) - 1)
        def _():
            # Single cross-lane/sublane reduction per chunk, broadcast into a
            # lane-dense (8, 128) output block.
            o_ref[...] = jnp.broadcast_to(jnp.max(acc_ref[...]), o_ref.shape)

    return kernel


@jax.jit
def unary_max(a: jax.Array) -> jax.Array:
    """max(a + a) over all elements; returns a 0-d array of a.dtype (== torch.max(a + a))."""
    flat = a.reshape(-1)
    n = flat.shape[0]

    # Lane width: as wide as possible (multiple of 128) without padding the input.
    if n >= LANE_WIDTH:
        lane = LANE_WIDTH
    elif n >= 128:
        lane = (n // 128) * 128
    else:
        lane = n  # block last dim == full array dim is allowed

    n_main = (n // lane) * lane
    rows = n_main // lane
    main = flat if n_main == n else flat[:n_main]
    main2d = main.reshape(rows, lane)

    row_tile = rows if rows <= ROW_TILE_MAX else ROW_TILE_MAX
    num_blocks = pl.cdiv(rows, row_tile)
    chunks = 2 if num_blocks >= 2 else 1                 # use both TCs on v7x
    inner = pl.cdiv(num_blocks, chunks)
    needs_mask = (chunks * inner * row_tile) != rows

    if chunks * inner == num_blocks:
        in_index = lambda c, i: (c * inner + i, 0)
    else:
        # Odd block count: clamp the padded trailing step back onto the last real block
        # (its contribution is fully masked to -inf inside the kernel).
        in_index = lambda c, i: (jnp.minimum(c * inner + i, num_blocks - 1), 0)

    partials = pl.pallas_call(
        _make_max_kernel(rows, row_tile, inner, needs_mask),
        out_shape=jax.ShapeDtypeStruct((chunks * 8, 128), jnp.float32),
        grid_spec=pltpu.PrefetchScalarGridSpec(
            num_scalar_prefetch=0,
            grid=(chunks, inner),
            in_specs=[pl.BlockSpec((row_tile, lane), in_index)],
            out_specs=pl.BlockSpec((8, 128), lambda c, i: (c, 0)),
            scratch_shapes=[pltpu.VMEM((row_tile, lane), jnp.float32)],
        ),
        compiler_params=pltpu.CompilerParams(
            dimension_semantics=("parallel", "arbitrary"),
        ),
    )(main2d)

    total = jnp.max(partials)                            # f32 scalar
    if n_main != n:                                      # tiny (< lane elems) unaligned tail
        total = jnp.maximum(total, jnp.max(flat[n_main:]).astype(jnp.float32))

    # max(a + a) == 2 * max(a) exactly (doubling is monotone and exact in IEEE floats).
    return (2.0 * total).astype(a.dtype)


if __name__ == "__main__":
    key = jax.random.PRNGKey(0)
    x = jax.random.normal(key, (2, 4, 16, 16), dtype=jnp.float32)

    result = unary_max(x)
    jax.block_until_ready(result)
    expected = jnp.max(x + x)
    assert result.shape == ()
    assert jnp.allclose(result, expected), (result, expected)

    # Extra self-checks exercising the multi-block grid, in-kernel masking,
    # odd block-count 2-way split, and the unaligned-tail path.
    k1, k2 = jax.random.split(key)
    x_big = jax.random.normal(k1, (4, 16, 128, 130), dtype=jnp.float32)   # rows=1040 -> 3 blocks
    r_big = unary_max(x_big)
    jax.block_until_ready(r_big)
    assert jnp.allclose(r_big, jnp.max(x_big + x_big)), (r_big, jnp.max(x_big + x_big))

    x_odd = jax.random.normal(k2, (3, 5, 7, 11), dtype=jnp.float32)       # n=1155 -> tail path
    r_odd = unary_max(x_odd)
    jax.block_until_ready(r_odd)
    assert jnp.allclose(r_odd, jnp.max(x_odd + x_odd)), (r_odd, jnp.max(x_odd + x_odd))

    print("KERNEL_OK")
</pallas_src>

<mosaic_0001>
module attributes {stable_mosaic.version = 11 : i64} {
  func.func @kernel(%arg0: i32, %arg1: i32, %arg2: memref<2x1024xf32, #tpu.memory_space<vmem>>, %arg3: memref<8x128xf32, #tpu.memory_space<vmem>>, %arg4: memref<2x1024xf32, #tpu.memory_space<vmem>>) attributes {dimension_semantics = [#tpu.dimension_semantics<parallel>, #tpu.dimension_semantics<arbitrary>], iteration_bounds = array<i64: 1, 1>, scalar_prefetch = 0 : i64, scratch_operands = 1 : i64, tpu.core_type = #tpu.core_type<tc>, window_params = [{transform_indices = @transform_0, window_bounds = array<i64: 2, 1024>}, {transform_indices = @transform_1, window_bounds = array<i64: 8, 128>}]} {
    %c0_i32 = arith.constant 0 : i32
    %0 = arith.cmpi eq, %arg1, %c0_i32 : i32
    %1 = arith.extui %0 : i1 to i32
    %c0_i32_0 = arith.constant 0 : i32
    %2 = arith.cmpi ne, %1, %c0_i32_0 : i32
    scf.if %2 {
      %cst = arith.constant 0xFF800000 : f32
      %10 = vector.broadcast %cst : f32 to vector<2x1024xf32>
      %c0_8 = arith.constant 0 : index
      %c0_9 = arith.constant 0 : index
      %11 = vector.load %arg4[%c0_8, %c0_9] : memref<2x1024xf32, #tpu.memory_space<vmem>>, vector<2x1024xf32>
      tpu.vector_store %arg4[%c0_8, %c0_9], %10 {strides = array<i32>} : memref<2x1024xf32, #tpu.memory_space<vmem>>, vector<2x1024xf32>,
    } else {
    }
    %c0 = arith.constant 0 : index
    %c0_1 = arith.constant 0 : index
    %3 = vector.load %arg2[%c0, %c0_1] : memref<2x1024xf32, #tpu.memory_space<vmem>>, vector<2x1024xf32>
    %c0_2 = arith.constant 0 : index
    %c0_3 = arith.constant 0 : index
    %4 = vector.load %arg4[%c0_2, %c0_3] : memref<2x1024xf32, #tpu.memory_space<vmem>>, vector<2x1024xf32>
    %5 = arith.maximumf %4, %3 : vector<2x1024xf32>
    %c0_4 = arith.constant 0 : index
    %c0_5 = arith.constant 0 : index
    %6 = vector.load %arg4[%c0_4, %c0_5] : memref<2x1024xf32, #tpu.memory_space<vmem>>, vector<2x1024xf32>
    tpu.vector_store %arg4[%c0_4, %c0_5], %5 {strides = array<i32>} : memref<2x1024xf32, #tpu.memory_space<vmem>>, vector<2x1024xf32>,
    %c0_i32_6 = arith.constant 0 : i32
    %7 = arith.cmpi eq, %arg1, %c0_i32_6 : i32
    %8 = arith.extui %7 : i1 to i32
    %c0_i32_7 = arith.constant 0 : i32
    %9 = arith.cmpi ne, %8, %c0_i32_7 : i32
    scf.if %9 {
      %c0_8 = arith.constant 0 : index
      %c0_9 = arith.constant 0 : index
      %10 = vector.load %arg4[%c0_8, %c0_9] : memref<2x1024xf32, #tpu.memory_space<vmem>>, vector<2x1024xf32>
      %11 = vector.shape_cast %10 : vector<2x1024xf32> to vector<1x2x1024xf32>
      %cst = arith.constant dense<0xFF800000> : vector<1xf32>
      %12 = vector.multi_reduction <maximumf>, %11, %cst [1, 2] : vector<1x2x1024xf32> to vector<1xf32>
      %13 = vector.shape_cast %12 : vector<1xf32> to vector<1x1x1xf32>
      %14 = vector.extract %13[0, 0, 0] : f32 from vector<1x1x1xf32>
      %15 = vector.broadcast %14 : f32 to vector<8x128xf32>
      %c0_10 = arith.constant 0 : index
      %c0_11 = arith.constant 0 : index
      %16 = vector.load %arg3[%c0_10, %c0_11] : memref<8x128xf32, #tpu.memory_space<vmem>>, vector<8x128xf32>
      tpu.vector_store %arg3[%c0_10, %c0_11], %15 {strides = array<i32>} : memref<8x128xf32, #tpu.memory_space<vmem>>, vector<8x128xf32>,
    } else {
    }
    return
  }
  func.func @transform_0(%arg0: i32, %arg1: i32) -> (i32, i32) {
    %c1_i32 = arith.constant 1 : i32
    %0 = arith.muli %arg0, %c1_i32 : i32
    %1 = arith.addi %0, %arg1 : i32
    %c0_i32 = arith.constant 0 : i32
    %c0_i32_0 = arith.constant 0 : i32
    return %1, %c0_i32 : i32, i32
  }
  func.func @transform_1(%arg0: i32, %arg1: i32) -> (i32, i32) {
    %c0_i32 = arith.constant 0 : i32
    %c0_i32_0 = arith.constant 0 : i32
    return %arg0, %c0_i32 : i32, i32
  }
}

</mosaic_0001>

<bundles_post_ra>
// kernel: unary_max.1
= control target key start
LH: loop header
LB: loop body
LE: loop exit
PB: predicated region body
PF: predicated region fallthrough
CT: control target
= control target key end

     0   :  { %v53_v0 = vlaneseq  ;;  %v133_v3 = vmov 1983009808   ;;  %vm91_vm0 = vcmask 1041408   ;;  %s161_s0 = inlined_call_operand.vmem [shape: f32[2,1024], index: 0, kind: input, shape index: {}]   ;;  %s162_s1 = inlined_call_operand.vmem [shape: f32[8,128], index: 1, kind: output, shape index: {}]  }
   0x1   :  { %v34_v1 = vld [vmem:[%s161_s0] sm:$0xff]  ;;  %v35_v2 = vld [vmem:[%s161_s0 + $0x8] sm:$0xff]  ;;  %v51_v4 = vunpack.c.l.s4 %v133_v3 }
   0x2   :  { %v54_v5 = vshrl.u32 %v53_v0, 7  ;;  %v49_v6 = vcombine.high %v34_v1, %v34_v1  ;;  %v66_v8 = vcombine.high %v35_v2, %v35_v2 }
   0x3   :  { %v52_v7 = vunpack.c.0.s8 %v51_v4 }
   0x5   :  { %v55_v9 = vsub.s32 %v52_v7, %v54_v5 }
   0x7   :  { %v56_v10 = vrot.slane %v34_v1, %v55_v9  ;;  %v63_v11 = vrot.slane %v49_v6, %v55_v9  ;;  %v73_v12 = vrot.slane %v35_v2, %v55_v9  ;;  %v80_v13 = vrot.slane %v66_v8, %v55_v9 }
   0x9   :  { %v64_v14 = vcombine.high %v56_v10, %v56_v10  ;;  %v65_v15 = vcombine.high %v63_v11, %v63_v11  ;;  %v81_v16 = vcombine.high %v73_v12, %v73_v12  ;;  %v82_v17 = vcombine.high %v80_v13, %v80_v13 }
   0xa   :  { %v92_v18 = vsel %vm91_vm0, %v56_v10, -inf  ;;  %v94_v19 = vsel %vm91_vm0, %v63_v11, -inf  ;;  %v96_v20 = vsel %vm91_vm0, %v73_v12, -inf  ;;  %v100_v21 = vsel %vm91_vm0, %v80_v13, -inf }
   0xb   :  { %v93_v22 = vsel %vm91_vm0, %v64_v14, -inf  ;;  %v95_v23 = vsel %vm91_vm0, %v65_v15, -inf  ;;  %v97_v24 = vmax.f32 %v92_v18, %v96_v20  ;;  %v98_v25 = vsel %vm91_vm0, %v81_v16, -inf }
   0xc   :  { %v99_v26 = vmax.f32 %v93_v22, %v98_v25  ;;  %v101_v27 = vmax.f32 %v94_v19, %v100_v21  ;;  %v102_v28 = vsel %vm91_vm0, %v82_v17, -inf }
   0xd   :  { %v103_v29 = vmax.f32 %v95_v23, %v102_v28 }
   0xe   :  { %v104_v30 = vmax.f32 %v97_v24, %v99_v26 }
   0xf   :  { %v105_v31 = vmax.f32 %v101_v27, %v103_v29 }
  0x11   :  { %v106_v32 = vmax.f32 %v104_v30, %v105_v31 }
  0x13   :  { %107 = vmax.xlane.f32.xlu0 %v106_v32 }
  0xa0   :  { %v108_v33 = vpop.xlane.xlu0 %107 }
  0xa1   :  { %v109_v34 = vrot.slane %v108_v33, 4 }
  0xa3   :  { %v110_v35 = vmax.f32 %v108_v33, %v109_v34 }
  0xa5   :  { %v111_v36 = vrot.slane %v110_v35, 2 }
  0xa7   :  { %v112_v37 = vmax.f32 %v110_v35, %v111_v36 }
  0xa9   :  { %v113_v38 = vrot.slane %v112_v37, 1 }
  0xab   :  { %v114_v39 = vmax.f32 %v112_v37, %v113_v38 }
  0xad   :  { %128 = vpush %v114_v39 }
  0xde   :  { %s129_s0 = spop %128 }
  0xdf   :  { %v116_v40 = vstv %s129_s0 }
  0xe0   :  { %117 = vst [vmem:[%s162_s1] sm:$0xff] %v116_v40 }

</bundles_post_ra>
